<compile_context>
chip_gen: v7x
topology: tpu7x:2x2x1
jax: 0.10.0
libtpu: 0.0.40
codegen_flags: <defaults>
</compile_context>

<pallas_src>
import functools

import jax
import jax.numpy as jnp
from jax.experimental import pallas as pl
from jax.experimental.pallas import tpu as pltpu


ROWS_PER_STEP = 8  # sublane-aligned output tile height


# ---------------- init-time table (matches PyTorch __init__ exactly) ----------------

def init_time_encoder(timestamps_num, time_embeddings_size, n=10000):
    d = time_embeddings_size // 2 * 2
    k = jnp.arange(timestamps_num, dtype=jnp.float32)[:, None]
    i = jnp.arange(d // 2, dtype=jnp.float32)[None, :]
    x = k / (n ** (2.0 * i / d))
    emb = jnp.zeros((timestamps_num, d), jnp.float32)
    emb = emb.at[:, 0::2].set(jnp.sin(x))
    emb = emb.at[:, 1::2].set(jnp.cos(x))
    return emb


# ---------------- Pallas gather kernel ----------------

def _gather_kernel(t_ref, emb_hbm, o_ref, row_buf, sems):
    """Gather rows emb_hbm[t[g*R + j]], j=0..R-1, into one (R, D) output tile."""
    g = pl.program_id(0)
    base = g * ROWS_PER_STEP

    # Issue all row DMAs first so they are in flight concurrently.
    for j in range(ROWS_PER_STEP):
        idx = t_ref[base + j]
        pltpu.make_async_copy(emb_hbm.at[pl.ds(idx, 1), :],
                              row_buf.at[pl.ds(j, 1), :],
                              sems.at[j]).start()
    # Then wait on each (wait only needs shapes + semaphore).
    for j in range(ROWS_PER_STEP):
        pltpu.make_async_copy(emb_hbm.at[pl.ds(0, 1), :],
                              row_buf.at[pl.ds(j, 1), :],
                              sems.at[j]).wait()

    o_ref[...] = row_buf[...]


@jax.jit
def _gather_rows(embeddings, t_pad):
    """t_pad: int32[B_pad] with B_pad % ROWS_PER_STEP == 0. Returns [B_pad, D]."""
    b_pad = t_pad.shape[0]
    d = embeddings.shape[1]
    grid = (b_pad // ROWS_PER_STEP,)
    return pl.pallas_call(
        _gather_kernel,
        out_shape=jax.ShapeDtypeStruct((b_pad, d), embeddings.dtype),
        grid_spec=pltpu.PrefetchScalarGridSpec(
            num_scalar_prefetch=1,
            grid=grid,
            in_specs=[pl.BlockSpec(memory_space=pl.ANY)],      # table stays in HBM
            out_specs=pl.BlockSpec((ROWS_PER_STEP, d), lambda g, t_ref: (g, 0)),
            scratch_shapes=[pltpu.VMEM((ROWS_PER_STEP, d), embeddings.dtype),
                            pltpu.SemaphoreType.DMA((ROWS_PER_STEP,))],
        ),
        compiler_params=pltpu.CompilerParams(
            dimension_semantics=("parallel",)),
    )(t_pad, embeddings)


def time_encoder_forward(embeddings, t):
    """Equivalent of TimeEncoder.forward: embeddings[t].

    `t` may be a python int (returns [1, D], like the PyTorch module) or an
    integer array of shape [B] (returns [B, D]).
    """
    if isinstance(t, int):
        t = jnp.array([t], dtype=jnp.int32)
    t = jnp.asarray(t, dtype=jnp.int32)
    b = t.shape[0]
    b_pad = ((b + ROWS_PER_STEP - 1) // ROWS_PER_STEP) * ROWS_PER_STEP
    t_pad = jnp.pad(t, (0, b_pad - b))          # pad with index 0 (valid row)
    out = _gather_rows(embeddings, t_pad)
    return out[:b]


# ---------------- demo / self-check ----------------

if __name__ == "__main__":
    key = jax.random.PRNGKey(0)

    timestamps_num = 1000
    time_embeddings_size = 128   # lane-dense (multiple of 128)
    batch = 8

    embeddings = init_time_encoder(timestamps_num, time_embeddings_size)
    t = jax.random.randint(key, (batch,), 0, timestamps_num, dtype=jnp.int32)

    out = time_encoder_forward(embeddings, t)
    out = jax.block_until_ready(out)
    assert out.shape == (batch, time_embeddings_size), out.shape

    # exact-match reference (gather is a byte copy)
    ref = embeddings[t]
    assert bool(jnp.array_equal(out, ref))

    # python-int path, like the PyTorch module's `isinstance(t, int)` branch
    out1 = jax.block_until_ready(time_encoder_forward(embeddings, 7))
    assert out1.shape == (1, time_embeddings_size), out1.shape
    assert bool(jnp.array_equal(out1[0], embeddings[7]))

    print("KERNEL_OK")
</pallas_src>

<mosaic_0001>
module attributes {stable_mosaic.version = 11 : i64} {
  func.func @_gather_kernel(%arg0: i32, %arg1: memref<8xi32, #tpu.memory_space<smem>>, %arg2: memref<1000x128xf32, #tpu.memory_space<any>>, %arg3: memref<8x128xf32, #tpu.memory_space<vmem>>, %arg4: memref<8x128xf32, #tpu.memory_space<vmem>>, %arg5: memref<8x!tpu.dma_semaphore, #tpu.memory_space<semaphore_mem>>) attributes {dimension_semantics = [#tpu.dimension_semantics<parallel>], iteration_bounds = array<i64: 1>, scalar_prefetch = 1 : i64, scratch_operands = 2 : i64, tpu.core_type = #tpu.core_type<tc>, window_params = [{}, {transform_indices = @transform_1, window_bounds = array<i64: 8, 128>}]} {
    %c8_i32 = arith.constant 8 : i32
    %0 = arith.muli %arg0, %c8_i32 : i32
    %c0_i32 = arith.constant 0 : i32
    %1 = arith.addi %0, %c0_i32 : i32
    %2 = arith.index_cast %1 : i32 to index
    %3 = memref.load %arg1[%2] : memref<8xi32, #tpu.memory_space<smem>>
    %c0_i32_0 = arith.constant 0 : i32
    %c0_i32_1 = arith.constant 0 : i32
    %4 = tpu.memref_slice %arg2[%3, %c0_i32_1] : memref<1000x128xf32, #tpu.memory_space<any>> -> memref<1x128xf32, #tpu.memory_space<any>>
    %c0_i32_2 = arith.constant 0 : i32
    %c0_i32_3 = arith.constant 0 : i32
    %5 = tpu.memref_slice %arg4[%c0_i32_2, %c0_i32_3] : memref<8x128xf32, #tpu.memory_space<vmem>> -> memref<1x128xf32, #tpu.memory_space<vmem>>
    %6 = tpu.memref_slice %arg5[%c0_i32_0] : memref<8x!tpu.dma_semaphore, #tpu.memory_space<semaphore_mem>> -> memref<1x!tpu.dma_semaphore, #tpu.memory_space<semaphore_mem>>
    %7 = tpu.memref_squeeze %6 : memref<1x!tpu.dma_semaphore, #tpu.memory_space<semaphore_mem>> -> memref<!tpu.dma_semaphore, #tpu.memory_space<semaphore_mem>>
    tpu.enqueue_dma source(%4 : memref<1x128xf32, #tpu.memory_space<any>>) target(%5 : memref<1x128xf32, #tpu.memory_space<vmem>>) target_semaphore(%7 : memref<!tpu.dma_semaphore, #tpu.memory_space<semaphore_mem>>)
    %c1_i32 = arith.constant 1 : i32
    %8 = arith.addi %0, %c1_i32 : i32
    %9 = arith.index_cast %8 : i32 to index
    %10 = memref.load %arg1[%9] : memref<8xi32, #tpu.memory_space<smem>>
    %c1_i32_4 = arith.constant 1 : i32
    %c0_i32_5 = arith.constant 0 : i32
    %11 = tpu.memref_slice %arg2[%10, %c0_i32_5] : memref<1000x128xf32, #tpu.memory_space<any>> -> memref<1x128xf32, #tpu.memory_space<any>>
    %c1_i32_6 = arith.constant 1 : i32
    %c0_i32_7 = arith.constant 0 : i32
    %12 = tpu.memref_slice %arg4[%c1_i32_6, %c0_i32_7] : memref<8x128xf32, #tpu.memory_space<vmem>> -> memref<1x128xf32, #tpu.memory_space<vmem>>
    %13 = tpu.memref_slice %arg5[%c1_i32_4] : memref<8x!tpu.dma_semaphore, #tpu.memory_space<semaphore_mem>> -> memref<1x!tpu.dma_semaphore, #tpu.memory_space<semaphore_mem>>
    %14 = tpu.memref_squeeze %13 : memref<1x!tpu.dma_semaphore, #tpu.memory_space<semaphore_mem>> -> memref<!tpu.dma_semaphore, #tpu.memory_space<semaphore_mem>>
    tpu.enqueue_dma source(%11 : memref<1x128xf32, #tpu.memory_space<any>>) target(%12 : memref<1x128xf32, #tpu.memory_space<vmem>>) target_semaphore(%14 : memref<!tpu.dma_semaphore, #tpu.memory_space<semaphore_mem>>)
    %c2_i32 = arith.constant 2 : i32
    %15 = arith.addi %0, %c2_i32 : i32
    %16 = arith.index_cast %15 : i32 to index
    %17 = memref.load %arg1[%16] : memref<8xi32, #tpu.memory_space<smem>>
    %c2_i32_8 = arith.constant 2 : i32
    %c0_i32_9 = arith.constant 0 : i32
    %18 = tpu.memref_slice %arg2[%17, %c0_i32_9] : memref<1000x128xf32, #tpu.memory_space<any>> -> memref<1x128xf32, #tpu.memory_space<any>>
    %c2_i32_10 = arith.constant 2 : i32
    %c0_i32_11 = arith.constant 0 : i32
    %19 = tpu.memref_slice %arg4[%c2_i32_10, %c0_i32_11] : memref<8x128xf32, #tpu.memory_space<vmem>> -> memref<1x128xf32, #tpu.memory_space<vmem>>
    %20 = tpu.memref_slice %arg5[%c2_i32_8] : memref<8x!tpu.dma_semaphore, #tpu.memory_space<semaphore_mem>> -> memref<1x!tpu.dma_semaphore, #tpu.memory_space<semaphore_mem>>
    %21 = tpu.memref_squeeze %20 : memref<1x!tpu.dma_semaphore, #tpu.memory_space<semaphore_mem>> -> memref<!tpu.dma_semaphore, #tpu.memory_space<semaphore_mem>>
    tpu.enqueue_dma source(%18 : memref<1x128xf32, #tpu.memory_space<any>>) target(%19 : memref<1x128xf32, #tpu.memory_space<vmem>>) target_semaphore(%21 : memref<!tpu.dma_semaphore, #tpu.memory_space<semaphore_mem>>)
    %c3_i32 = arith.constant 3 : i32
    %22 = arith.addi %0, %c3_i32 : i32
    %23 = arith.index_cast %22 : i32 to index
    %24 = memref.load %arg1[%23] : memref<8xi32, #tpu.memory_space<smem>>
    %c3_i32_12 = arith.constant 3 : i32
    %c0_i32_13 = arith.constant 0 : i32
    %25 = tpu.memref_slice %arg2[%24, %c0_i32_13] : memref<1000x128xf32, #tpu.memory_space<any>> -> memref<1x128xf32, #tpu.memory_space<any>>
    %c3_i32_14 = arith.constant 3 : i32
    %c0_i32_15 = arith.constant 0 : i32
    %26 = tpu.memref_slice %arg4[%c3_i32_14, %c0_i32_15] : memref<8x128xf32, #tpu.memory_space<vmem>> -> memref<1x128xf32, #tpu.memory_space<vmem>>
    %27 = tpu.memref_slice %arg5[%c3_i32_12] : memref<8x!tpu.dma_semaphore, #tpu.memory_space<semaphore_mem>> -> memref<1x!tpu.dma_semaphore, #tpu.memory_space<semaphore_mem>>
    %28 = tpu.memref_squeeze %27 : memref<1x!tpu.dma_semaphore, #tpu.memory_space<semaphore_mem>> -> memref<!tpu.dma_semaphore, #tpu.memory_space<semaphore_mem>>
    tpu.enqueue_dma source(%25 : memref<1x128xf32, #tpu.memory_space<any>>) target(%26 : memref<1x128xf32, #tpu.memory_space<vmem>>) target_semaphore(%28 : memref<!tpu.dma_semaphore, #tpu.memory_space<semaphore_mem>>)
    %c4_i32 = arith.constant 4 : i32
    %29 = arith.addi %0, %c4_i32 : i32
    %30 = arith.index_cast %29 : i32 to index
    %31 = memref.load %arg1[%30] : memref<8xi32, #tpu.memory_space<smem>>
    %c4_i32_16 = arith.constant 4 : i32
    %c0_i32_17 = arith.constant 0 : i32
    %32 = tpu.memref_slice %arg2[%31, %c0_i32_17] : memref<1000x128xf32, #tpu.memory_space<any>> -> memref<1x128xf32, #tpu.memory_space<any>>
    %c4_i32_18 = arith.constant 4 : i32
    %c0_i32_19 = arith.constant 0 : i32
    %33 = tpu.memref_slice %arg4[%c4_i32_18, %c0_i32_19] : memref<8x128xf32, #tpu.memory_space<vmem>> -> memref<1x128xf32, #tpu.memory_space<vmem>>
    %34 = tpu.memref_slice %arg5[%c4_i32_16] : memref<8x!tpu.dma_semaphore, #tpu.memory_space<semaphore_mem>> -> memref<1x!tpu.dma_semaphore, #tpu.memory_space<semaphore_mem>>
    %35 = tpu.memref_squeeze %34 : memref<1x!tpu.dma_semaphore, #tpu.memory_space<semaphore_mem>> -> memref<!tpu.dma_semaphore, #tpu.memory_space<semaphore_mem>>
    tpu.enqueue_dma source(%32 : memref<1x128xf32, #tpu.memory_space<any>>) target(%33 : memref<1x128xf32, #tpu.memory_space<vmem>>) target_semaphore(%35 : memref<!tpu.dma_semaphore, #tpu.memory_space<semaphore_mem>>)
    %c5_i32 = arith.constant 5 : i32
    %36 = arith.addi %0, %c5_i32 : i32
    %37 = arith.index_cast %36 : i32 to index
    %38 = memref.load %arg1[%37] : memref<8xi32, #tpu.memory_space<smem>>
    %c5_i32_20 = arith.constant 5 : i32
    %c0_i32_21 = arith.constant 0 : i32
    %39 = tpu.memref_slice %arg2[%38, %c0_i32_21] : memref<1000x128xf32, #tpu.memory_space<any>> -> memref<1x128xf32, #tpu.memory_space<any>>
    %c5_i32_22 = arith.constant 5 : i32
    %c0_i32_23 = arith.constant 0 : i32
    %40 = tpu.memref_slice %arg4[%c5_i32_22, %c0_i32_23] : memref<8x128xf32, #tpu.memory_space<vmem>> -> memref<1x128xf32, #tpu.memory_space<vmem>>
    %41 = tpu.memref_slice %arg5[%c5_i32_20] : memref<8x!tpu.dma_semaphore, #tpu.memory_space<semaphore_mem>> -> memref<1x!tpu.dma_semaphore, #tpu.memory_space<semaphore_mem>>
    %42 = tpu.memref_squeeze %41 : memref<1x!tpu.dma_semaphore, #tpu.memory_space<semaphore_mem>> -> memref<!tpu.dma_semaphore, #tpu.memory_space<semaphore_mem>>
    tpu.enqueue_dma source(%39 : memref<1x128xf32, #tpu.memory_space<any>>) target(%40 : memref<1x128xf32, #tpu.memory_space<vmem>>) target_semaphore(%42 : memref<!tpu.dma_semaphore, #tpu.memory_space<semaphore_mem>>)
    %c6_i32 = arith.constant 6 : i32
    %43 = arith.addi %0, %c6_i32 : i32
    %44 = arith.index_cast %43 : i32 to index
    %45 = memref.load %arg1[%44] : memref<8xi32, #tpu.memory_space<smem>>
    %c6_i32_24 = arith.constant 6 : i32
    %c0_i32_25 = arith.constant 0 : i32
    %46 = tpu.memref_slice %arg2[%45, %c0_i32_25] : memref<1000x128xf32, #tpu.memory_space<any>> -> memref<1x128xf32, #tpu.memory_space<any>>
    %c6_i32_26 = arith.constant 6 : i32
    %c0_i32_27 = arith.constant 0 : i32
    %47 = tpu.memref_slice %arg4[%c6_i32_26, %c0_i32_27] : memref<8x128xf32, #tpu.memory_space<vmem>> -> memref<1x128xf32, #tpu.memory_space<vmem>>
    %48 = tpu.memref_slice %arg5[%c6_i32_24] : memref<8x!tpu.dma_semaphore, #tpu.memory_space<semaphore_mem>> -> memref<1x!tpu.dma_semaphore, #tpu.memory_space<semaphore_mem>>
    %49 = tpu.memref_squeeze %48 : memref<1x!tpu.dma_semaphore, #tpu.memory_space<semaphore_mem>> -> memref<!tpu.dma_semaphore, #tpu.memory_space<semaphore_mem>>
    tpu.enqueue_dma source(%46 : memref<1x128xf32, #tpu.memory_space<any>>) target(%47 : memref<1x128xf32, #tpu.memory_space<vmem>>) target_semaphore(%49 : memref<!tpu.dma_semaphore, #tpu.memory_space<semaphore_mem>>)
    %c7_i32 = arith.constant 7 : i32
    %50 = arith.addi %0, %c7_i32 : i32
    %51 = arith.index_cast %50 : i32 to index
    %52 = memref.load %arg1[%51] : memref<8xi32, #tpu.memory_space<smem>>
    %c7_i32_28 = arith.constant 7 : i32
    %c0_i32_29 = arith.constant 0 : i32
    %53 = tpu.memref_slice %arg2[%52, %c0_i32_29] : memref<1000x128xf32, #tpu.memory_space<any>> -> memref<1x128xf32, #tpu.memory_space<any>>
    %c7_i32_30 = arith.constant 7 : i32
    %c0_i32_31 = arith.constant 0 : i32
    %54 = tpu.memref_slice %arg4[%c7_i32_30, %c0_i32_31] : memref<8x128xf32, #tpu.memory_space<vmem>> -> memref<1x128xf32, #tpu.memory_space<vmem>>
    %55 = tpu.memref_slice %arg5[%c7_i32_28] : memref<8x!tpu.dma_semaphore, #tpu.memory_space<semaphore_mem>> -> memref<1x!tpu.dma_semaphore, #tpu.memory_space<semaphore_mem>>
    %56 = tpu.memref_squeeze %55 : memref<1x!tpu.dma_semaphore, #tpu.memory_space<semaphore_mem>> -> memref<!tpu.dma_semaphore, #tpu.memory_space<semaphore_mem>>
    tpu.enqueue_dma source(%53 : memref<1x128xf32, #tpu.memory_space<any>>) target(%54 : memref<1x128xf32, #tpu.memory_space<vmem>>) target_semaphore(%56 : memref<!tpu.dma_semaphore, #tpu.memory_space<semaphore_mem>>)
    %c0_i32_32 = arith.constant 0 : i32
    %c0_i32_33 = arith.constant 0 : i32
    %c0_i32_34 = arith.constant 0 : i32
    %57 = tpu.memref_slice %arg2[%c0_i32_33, %c0_i32_34] : memref<1000x128xf32, #tpu.memory_space<any>> -> memref<1x128xf32, #tpu.memory_space<any>>
    %c0_i32_35 = arith.constant 0 : i32
    %c0_i32_36 = arith.constant 0 : i32
    %58 = tpu.memref_slice %arg4[%c0_i32_35, %c0_i32_36] : memref<8x128xf32, #tpu.memory_space<vmem>> -> memref<1x128xf32, #tpu.memory_space<vmem>>
    %59 = tpu.memref_slice %arg5[%c0_i32_32] : memref<8x!tpu.dma_semaphore, #tpu.memory_space<semaphore_mem>> -> memref<1x!tpu.dma_semaphore, #tpu.memory_space<semaphore_mem>>
    %60 = tpu.memref_squeeze %59 : memref<1x!tpu.dma_semaphore, #tpu.memory_space<semaphore_mem>> -> memref<!tpu.dma_semaphore, #tpu.memory_space<semaphore_mem>>
    tpu.wait_dma2 semaphore(%60 : memref<!tpu.dma_semaphore, #tpu.memory_space<semaphore_mem>>) src(%57 : memref<1x128xf32, #tpu.memory_space<any>>) dst(%58 : memref<1x128xf32, #tpu.memory_space<vmem>>)
    %c1_i32_37 = arith.constant 1 : i32
    %c0_i32_38 = arith.constant 0 : i32
    %c0_i32_39 = arith.constant 0 : i32
    %61 = tpu.memref_slice %arg2[%c0_i32_38, %c0_i32_39] : memref<1000x128xf32, #tpu.memory_space<any>> -> memref<1x128xf32, #tpu.memory_space<any>>
    %c1_i32_40 = arith.constant 1 : i32
    %c0_i32_41 = arith.constant 0 : i32
    %62 = tpu.memref_slice %arg4[%c1_i32_40, %c0_i32_41] : memref<8x128xf32, #tpu.memory_space<vmem>> -> memref<1x128xf32, #tpu.memory_space<vmem>>
    %63 = tpu.memref_slice %arg5[%c1_i32_37] : memref<8x!tpu.dma_semaphore, #tpu.memory_space<semaphore_mem>> -> memref<1x!tpu.dma_semaphore, #tpu.memory_space<semaphore_mem>>
    %64 = tpu.memref_squeeze %63 : memref<1x!tpu.dma_semaphore, #tpu.memory_space<semaphore_mem>> -> memref<!tpu.dma_semaphore, #tpu.memory_space<semaphore_mem>>
    tpu.wait_dma2 semaphore(%64 : memref<!tpu.dma_semaphore, #tpu.memory_space<semaphore_mem>>) src(%61 : memref<1x128xf32, #tpu.memory_space<any>>) dst(%62 : memref<1x128xf32, #tpu.memory_space<vmem>>)
    %c2_i32_42 = arith.constant 2 : i32
    %c0_i32_43 = arith.constant 0 : i32
    %c0_i32_44 = arith.constant 0 : i32
    %65 = tpu.memref_slice %arg2[%c0_i32_43, %c0_i32_44] : memref<1000x128xf32, #tpu.memory_space<any>> -> memref<1x128xf32, #tpu.memory_space<any>>
    %c2_i32_45 = arith.constant 2 : i32
    %c0_i32_46 = arith.constant 0 : i32
    %66 = tpu.memref_slice %arg4[%c2_i32_45, %c0_i32_46] : memref<8x128xf32, #tpu.memory_space<vmem>> -> memref<1x128xf32, #tpu.memory_space<vmem>>
    %67 = tpu.memref_slice %arg5[%c2_i32_42] : memref<8x!tpu.dma_semaphore, #tpu.memory_space<semaphore_mem>> -> memref<1x!tpu.dma_semaphore, #tpu.memory_space<semaphore_mem>>
    %68 = tpu.memref_squeeze %67 : memref<1x!tpu.dma_semaphore, #tpu.memory_space<semaphore_mem>> -> memref<!tpu.dma_semaphore, #tpu.memory_space<semaphore_mem>>
    tpu.wait_dma2 semaphore(%68 : memref<!tpu.dma_semaphore, #tpu.memory_space<semaphore_mem>>) src(%65 : memref<1x128xf32, #tpu.memory_space<any>>) dst(%66 : memref<1x128xf32, #tpu.memory_space<vmem>>)
    %c3_i32_47 = arith.constant 3 : i32
    %c0_i32_48 = arith.constant 0 : i32
    %c0_i32_49 = arith.constant 0 : i32
    %69 = tpu.memref_slice %arg2[%c0_i32_48, %c0_i32_49] : memref<1000x128xf32, #tpu.memory_space<any>> -> memref<1x128xf32, #tpu.memory_space<any>>
    %c3_i32_50 = arith.constant 3 : i32
    %c0_i32_51 = arith.constant 0 : i32
    %70 = tpu.memref_slice %arg4[%c3_i32_50, %c0_i32_51] : memref<8x128xf32, #tpu.memory_space<vmem>> -> memref<1x128xf32, #tpu.memory_space<vmem>>
    %71 = tpu.memref_slice %arg5[%c3_i32_47] : memref<8x!tpu.dma_semaphore, #tpu.memory_space<semaphore_mem>> -> memref<1x!tpu.dma_semaphore, #tpu.memory_space<semaphore_mem>>
    %72 = tpu.memref_squeeze %71 : memref<1x!tpu.dma_semaphore, #tpu.memory_space<semaphore_mem>> -> memref<!tpu.dma_semaphore, #tpu.memory_space<semaphore_mem>>
    tpu.wait_dma2 semaphore(%72 : memref<!tpu.dma_semaphore, #tpu.memory_space<semaphore_mem>>) src(%69 : memref<1x128xf32, #tpu.memory_space<any>>) dst(%70 : memref<1x128xf32, #tpu.memory_space<vmem>>)
    %c4_i32_52 = arith.constant 4 : i32
    %c0_i32_53 = arith.constant 0 : i32
    %c0_i32_54 = arith.constant 0 : i32
    %73 = tpu.memref_slice %arg2[%c0_i32_53, %c0_i32_54] : memref<1000x128xf32, #tpu.memory_space<any>> -> memref<1x128xf32, #tpu.memory_space<any>>
    %c4_i32_55 = arith.constant 4 : i32
    %c0_i32_56 = arith.constant 0 : i32
    %74 = tpu.memref_slice %arg4[%c4_i32_55, %c0_i32_56] : memref<8x128xf32, #tpu.memory_space<vmem>> -> memref<1x128xf32, #tpu.memory_space<vmem>>
    %75 = tpu.memref_slice %arg5[%c4_i32_52] : memref<8x!tpu.dma_semaphore, #tpu.memory_space<semaphore_mem>> -> memref<1x!tpu.dma_semaphore, #tpu.memory_space<semaphore_mem>>
    %76 = tpu.memref_squeeze %75 : memref<1x!tpu.dma_semaphore, #tpu.memory_space<semaphore_mem>> -> memref<!tpu.dma_semaphore, #tpu.memory_space<semaphore_mem>>
    tpu.wait_dma2 semaphore(%76 : memref<!tpu.dma_semaphore, #tpu.memory_space<semaphore_mem>>) src(%73 : memref<1x128xf32, #tpu.memory_space<any>>) dst(%74 : memref<1x128xf32, #tpu.memory_space<vmem>>)
    %c5_i32_57 = arith.constant 5 : i32
    %c0_i32_58 = arith.constant 0 : i32
    %c0_i32_59 = arith.constant 0 : i32
    %77 = tpu.memref_slice %arg2[%c0_i32_58, %c0_i32_59] : memref<1000x128xf32, #tpu.memory_space<any>> -> memref<1x128xf32, #tpu.memory_space<any>>
    %c5_i32_60 = arith.constant 5 : i32
    %c0_i32_61 = arith.constant 0 : i32
    %78 = tpu.memref_slice %arg4[%c5_i32_60, %c0_i32_61] : memref<8x128xf32, #tpu.memory_space<vmem>> -> memref<1x128xf32, #tpu.memory_space<vmem>>
    %79 = tpu.memref_slice %arg5[%c5_i32_57] : memref<8x!tpu.dma_semaphore, #tpu.memory_space<semaphore_mem>> -> memref<1x!tpu.dma_semaphore, #tpu.memory_space<semaphore_mem>>
    %80 = tpu.memref_squeeze %79 : memref<1x!tpu.dma_semaphore, #tpu.memory_space<semaphore_mem>> -> memref<!tpu.dma_semaphore, #tpu.memory_space<semaphore_mem>>
    tpu.wait_dma2 semaphore(%80 : memref<!tpu.dma_semaphore, #tpu.memory_space<semaphore_mem>>) src(%77 : memref<1x128xf32, #tpu.memory_space<any>>) dst(%78 : memref<1x128xf32, #tpu.memory_space<vmem>>)
    %c6_i32_62 = arith.constant 6 : i32
    %c0_i32_63 = arith.constant 0 : i32
    %c0_i32_64 = arith.constant 0 : i32
    %81 = tpu.memref_slice %arg2[%c0_i32_63, %c0_i32_64] : memref<1000x128xf32, #tpu.memory_space<any>> -> memref<1x128xf32, #tpu.memory_space<any>>
    %c6_i32_65 = arith.constant 6 : i32
    %c0_i32_66 = arith.constant 0 : i32
    %82 = tpu.memref_slice %arg4[%c6_i32_65, %c0_i32_66] : memref<8x128xf32, #tpu.memory_space<vmem>> -> memref<1x128xf32, #tpu.memory_space<vmem>>
    %83 = tpu.memref_slice %arg5[%c6_i32_62] : memref<8x!tpu.dma_semaphore, #tpu.memory_space<semaphore_mem>> -> memref<1x!tpu.dma_semaphore, #tpu.memory_space<semaphore_mem>>
    %84 = tpu.memref_squeeze %83 : memref<1x!tpu.dma_semaphore, #tpu.memory_space<semaphore_mem>> -> memref<!tpu.dma_semaphore, #tpu.memory_space<semaphore_mem>>
    tpu.wait_dma2 semaphore(%84 : memref<!tpu.dma_semaphore, #tpu.memory_space<semaphore_mem>>) src(%81 : memref<1x128xf32, #tpu.memory_space<any>>) dst(%82 : memref<1x128xf32, #tpu.memory_space<vmem>>)
    %c7_i32_67 = arith.constant 7 : i32
    %c0_i32_68 = arith.constant 0 : i32
    %c0_i32_69 = arith.constant 0 : i32
    %85 = tpu.memref_slice %arg2[%c0_i32_68, %c0_i32_69] : memref<1000x128xf32, #tpu.memory_space<any>> -> memref<1x128xf32, #tpu.memory_space<any>>
    %c7_i32_70 = arith.constant 7 : i32
    %c0_i32_71 = arith.constant 0 : i32
    %86 = tpu.memref_slice %arg4[%c7_i32_70, %c0_i32_71] : memref<8x128xf32, #tpu.memory_space<vmem>> -> memref<1x128xf32, #tpu.memory_space<vmem>>
    %87 = tpu.memref_slice %arg5[%c7_i32_67] : memref<8x!tpu.dma_semaphore, #tpu.memory_space<semaphore_mem>> -> memref<1x!tpu.dma_semaphore, #tpu.memory_space<semaphore_mem>>
    %88 = tpu.memref_squeeze %87 : memref<1x!tpu.dma_semaphore, #tpu.memory_space<semaphore_mem>> -> memref<!tpu.dma_semaphore, #tpu.memory_space<semaphore_mem>>
    tpu.wait_dma2 semaphore(%88 : memref<!tpu.dma_semaphore, #tpu.memory_space<semaphore_mem>>) src(%85 : memref<1x128xf32, #tpu.memory_space<any>>) dst(%86 : memref<1x128xf32, #tpu.memory_space<vmem>>)
    %c0 = arith.constant 0 : index
    %c0_72 = arith.constant 0 : index
    %89 = vector.load %arg4[%c0, %c0_72] : memref<8x128xf32, #tpu.memory_space<vmem>>, vector<8x128xf32>
    %c0_73 = arith.constant 0 : index
    %c0_74 = arith.constant 0 : index
    %90 = vector.load %arg3[%c0_73, %c0_74] : memref<8x128xf32, #tpu.memory_space<vmem>>, vector<8x128xf32>
    tpu.vector_store %arg3[%c0_73, %c0_74], %89 {strides = array<i32>} : memref<8x128xf32, #tpu.memory_space<vmem>>, vector<8x128xf32>,
    return
  }
  func.func @transform_1(%arg0: i32, %arg1: memref<8xi32, #tpu.memory_space<smem>>) -> (i32, i32) {
    %c0_i32 = arith.constant 0 : i32
    %c0_i32_0 = arith.constant 0 : i32
    return %arg0, %c0_i32 : i32, i32
  }
}

</mosaic_0001>

<bundles_post_ra>
// kernel: _gather_rows.1
= control target key start
LH: loop header
LB: loop body
LE: loop exit
PB: predicated region body
PF: predicated region fallthrough
CT: control target
= control target key end

     0   :  { %s699_s0 = inlined_call_operand.vmem [shape: s32[8], index: 0, kind: input, shape index: {}]   ;;  %s700_s1 = inlined_call_operand.hbm [shape: f32[1000,128], index: 1, kind: input, shape index: {}]   ;;  %s701_s2 = inlined_call_operand.hbm [shape: f32[8,128], index: 2, kind: output, shape index: {}]  }
   0x1   :  { %s7_s11 = sshll.u32 %s699_s0, 4  ;;  %s8_s11 = int_to_ptr.vmem [resolvable:$true] %s7_s11 }
   0x2   :  { %s285_s12 = scalar_lea.vmem %s8_s11, 16  ;;  %p290_p1 = scmp.lt.s32.totalorder %s8_s11, %s8_s11 }
   0x3   :  { %p286_p0 = scmp.ne.s32.totalorder %s8_s11, %s285_s12  ;;  %p291_p2 = scmp.lt.s32.totalorder %s285_s12, %s285_s12 }
   0x5   :  { %p292_p3 = por %p291_p2, %p290_p1 }
   0x7   :  { %p293_p4 = pnand %p292_p3, %p286_p0 }
   0x9   :  { %296 = shalt.err (!%p293_p4)  }
   0xa   :  { %s531_s13 = smov [#allocation5]  }
   0xb   :  { %10 = dma.vmem_to_smem %s8_s11, 16, %s531_s13, [#allocation4] }
   0xc   :  { %511 = dma.done.wait [#allocation4], 16 }
   0xd   :  { %512 = vsyncadd [#allocation4], 4294967280 }
   0xe   :  { %12 = sfence }
   0xf   :  { %13 = vsyncpa [#allocation7], 0  ;;  %s15_s14 = sld [smem:[#allocation5]]  ;;  %s532_s15 = smov [#allocation2]  }
  0x10   :  { %s25_s16 = sshll.u32 %s532_s15, 4  ;;  %s559_s17 = sld [smem:[#allocation5 + $0x1]]  ;;  %s561_s16 = int_to_ptr.vmem [resolvable:$true] %s25_s16 }
  0x11   :  { %s533_s0 = smov [#allocation2 + $0x1]   ;;  %s563_s19 = sld [smem:[#allocation5 + $0x2]] }
  0x12   :  { %s42_s18 = sshll.u32 %s533_s0, 4  ;;  %s534_s20 = smov [#allocation2 + $0x2]   ;;  %s565_s18 = int_to_ptr.vmem [resolvable:$true] %s42_s18 }
  0x13   :  { %s59_s21 = sshll.u32 %s534_s20, 4  ;;  %s567_s22 = sld [smem:[#allocation5 + $0x3]]  ;;  %s569_s21 = int_to_ptr.vmem [resolvable:$true] %s59_s21 }
  0x14   :  { %s578_s3 = scalar_lea.hbm %s700_s1, 16000 }
  0x15   :  { %s252_s23 = sshll.u32 %s15_s14, 4 }
  0x16   :  { %s17_s26 = scalar_lea.hbm %s700_s1, %s252_s23  ;;  %s254_s27 = sshll.u32 %s559_s17, 4 }
  0x17   :  { %s297_s28 = scalar_lea.hbm %s17_s26, 16  ;;  %p300_p6 = scmp.lt.u32.totalorder %s17_s26, %s700_s1 }
  0x18   :  { %p298_p5 = scmp.ne.s32.totalorder %s17_s26, %s297_s28  ;;  %p301_p7 = scmp.lt.u32.totalorder %s578_s3, %s297_s28 }
  0x19   :  { %p303_p9 = scmp.lt.u32.totalorder %s297_s28, %s17_s26 }
  0x1a   :  { %p302_p8 = por %p301_p7, %p300_p6 }
  0x1c   :  { %p304_p10 = por %p303_p9, %p302_p8 }
  0x1e   :  { %p305_p11 = pnand %p304_p10, %p298_p5 }
  0x20   :  { %308 = shalt.err (!%p305_p11)  }
  0x21   :  { %s309_s6 = scalar_lea.vmem %s561_s16, 16  ;;  %s587_s7 = scalar_lea.vmem %s561_s16, 128 }
  0x22   :  { %p310_p12 = scmp.ne.s32.totalorder %s561_s16, %s309_s6  ;;  %p314_p13 = scmp.lt.s32.totalorder %s561_s16, %s561_s16 }
  0x23   :  { %p315_p0 = scmp.lt.s32.totalorder %s587_s7, %s309_s6 }
  0x25   :  { %p316_p1 = por %p315_p0, %p314_p13 }
  0x27   :  { %p317_p2 = pnand %p316_p1, %p310_p12 }
  0x29   :  { %320 = shalt.err (!%p317_p2)  }
  0x2a   :  { %28 = dma.hbm_to_vmem [thread:$0]  %s17_s26, 16, %s561_s16, [#allocation3] }
  0x2b   :  { %s32_s10 = scalar_lea.hbm %s700_s1, %s254_s27  ;;  %s256_s11 = sshll.u32 %s563_s19, 4 }
  0x2c   :  { %s321_s12 = scalar_lea.hbm %s32_s10, 16  ;;  %p324_p4 = scmp.lt.u32.totalorder %s32_s10, %s700_s1 }
  0x2d   :  { %p322_p3 = scmp.ne.s32.totalorder %s32_s10, %s321_s12  ;;  %p325_p5 = scmp.lt.u32.totalorder %s578_s3, %s321_s12 }
  0x2e   :  { %p327_p7 = scmp.lt.u32.totalorder %s321_s12, %s32_s10 }
  0x2f   :  { %p326_p6 = por %p325_p5, %p324_p4 }
  0x31   :  { %p328_p8 = por %p327_p7, %p326_p6 }
  0x33   :  { %p329_p9 = pnand %p328_p8, %p322_p3 }
  0x35   :  { %332 = shalt.err (!%p329_p9)  }
  0x36   :  { %s333_s15 = scalar_lea.vmem %s565_s18, 16  ;;  %p338_p11 = scmp.lt.s32.totalorder %s565_s18, %s561_s16 }
  0x37   :  { %p334_p10 = scmp.ne.s32.totalorder %s565_s18, %s333_s15  ;;  %p339_p12 = scmp.lt.s32.totalorder %s587_s7, %s333_s15 }
  0x39   :  { %p340_p13 = por %p339_p12, %p338_p11 }
  0x3b   :  { %p341_p0 = pnand %p340_p13, %p334_p10 }
  0x3d   :  { %344 = shalt.err (!%p341_p0)  }
  0x3e   :  { %45 = dma.hbm_to_vmem [thread:$0]  %s32_s10, 16, %s565_s18, [#allocation3 + $0x1] }
  0x3f   :  { %s49_s19 = scalar_lea.hbm %s700_s1, %s256_s11  ;;  %s258_s20 = sshll.u32 %s567_s22, 4 }
  0x40   :  { %s345_s23 = scalar_lea.hbm %s49_s19, 16  ;;  %p348_p2 = scmp.lt.u32.totalorder %s49_s19, %s700_s1 }
  0x41   :  { %p346_p1 = scmp.ne.s32.totalorder %s49_s19, %s345_s23  ;;  %p349_p3 = scmp.lt.u32.totalorder %s578_s3, %s345_s23 }
  0x42   :  { %p351_p5 = scmp.lt.u32.totalorder %s345_s23, %s49_s19 }
  0x43   :  { %p350_p4 = por %p349_p3, %p348_p2 }
  0x45   :  { %p352_p6 = por %p351_p5, %p350_p4 }
  0x47   :  { %p353_p7 = pnand %p352_p6, %p346_p1 }
  0x49   :  { %356 = shalt.err (!%p353_p7)  }
  0x4a   :  { %s357_s18 = scalar_lea.vmem %s569_s21, 16  ;;  %p362_p9 = scmp.lt.s32.totalorder %s569_s21, %s561_s16 }
  0x4b   :  { %p358_p8 = scmp.ne.s32.totalorder %s569_s21, %s357_s18  ;;  %p363_p10 = scmp.lt.s32.totalorder %s587_s7, %s357_s18 }
  0x4d   :  { %p364_p11 = por %p363_p10, %p362_p9 }
  0x4f   :  { %p365_p12 = pnand %p364_p11, %p358_p8 }
  0x51   :  { %368 = shalt.err (!%p365_p12)  }
  0x52   :  { %62 = dma.hbm_to_vmem [thread:$0]  %s49_s19, 16, %s569_s21, [#allocation3 + $0x2] }
  0x53   :  { %s66_s27 = scalar_lea.hbm %s700_s1, %s258_s20  ;;  %s535_s28 = smov [#allocation2 + $0x3]  }
  0x54   :  { %s76_s29 = sshll.u32 %s535_s28, 4  ;;  %s624_s30 = sld [smem:[#allocation5 + $0x4]]  ;;  %s77_s29 = int_to_ptr.vmem [resolvable:$true] %s76_s29 }
  0x55   :  { %s369_s4 = scalar_lea.hbm %s66_s27, 16  ;;  %p372_p0 = scmp.lt.u32.totalorder %s66_s27, %s700_s1 }
  0x56   :  { %p370_p13 = scmp.ne.s32.totalorder %s66_s27, %s369_s4  ;;  %p373_p1 = scmp.lt.u32.totalorder %s578_s3, %s369_s4 }
  0x57   :  { %p375_p3 = scmp.lt.u32.totalorder %s369_s4, %s66_s27 }
  0x58   :  { %p374_p2 = por %p373_p1, %p372_p0 }
  0x5a   :  { %p376_p4 = por %p375_p3, %p374_p2 }
  0x5c   :  { %p377_p5 = pnand %p376_p4, %p370_p13 }
  0x5e   :  { %380 = shalt.err (!%p377_p5)  }
  0x5f   :  { %s381_s21 = scalar_lea.vmem %s77_s29, 16  ;;  %p386_p7 = scmp.lt.s32.totalorder %s77_s29, %s561_s16 }
  0x60   :  { %p382_p6 = scmp.ne.s32.totalorder %s77_s29, %s381_s21  ;;  %p387_p8 = scmp.lt.s32.totalorder %s587_s7, %s381_s21 }
  0x62   :  { %p388_p9 = por %p387_p8, %p386_p7 }
  0x64   :  { %p389_p10 = pnand %p388_p9, %p382_p6 }
  0x66   :  { %392 = shalt.err (!%p389_p10)  }
  0x67   :  { %79 = dma.hbm_to_vmem [thread:$0]  %s66_s27, 16, %s77_s29, [#allocation3 + $0x3] }
  0x68   :  { %s536_s8 = smov [#allocation2 + $0x4]   ;;  %s632_s10 = sld [smem:[#allocation5 + $0x5]] }
  0x69   :  { %s93_s9 = sshll.u32 %s536_s8, 4  ;;  %s537_s11 = smov [#allocation2 + $0x5]   ;;  %s94_s9 = int_to_ptr.vmem [resolvable:$true] %s93_s9 }
  0x6a   :  { %s110_s12 = sshll.u32 %s537_s11, 4  ;;  %s634_s13 = sld [smem:[#allocation5 + $0x6]]  ;;  %s637_s12 = int_to_ptr.vmem [resolvable:$true] %s110_s12 }
  0x6b   :  { %s260_s14 = sshll.u32 %s624_s30, 4 }
  0x6c   :  { %s83_s0 = scalar_lea.hbm %s700_s1, %s260_s14 }
  0x6d   :  { %s393_s19 = scalar_lea.hbm %s83_s0, 16  ;;  %p396_p12 = scmp.lt.u32.totalorder %s83_s0, %s700_s1 }
  0x6e   :  { %p394_p11 = scmp.ne.s32.totalorder %s83_s0, %s393_s19  ;;  %p397_p13 = scmp.lt.u32.totalorder %s578_s3, %s393_s19 }
  0x6f   :  { %p399_p1 = scmp.lt.u32.totalorder %s393_s19, %s83_s0 }
  0x70   :  { %p398_p0 = por %p397_p13, %p396_p12 }
  0x72   :  { %p400_p2 = por %p399_p1, %p398_p0 }
  0x74   :  { %p401_p3 = pnand %p400_p2, %p394_p11 }
  0x76   :  { %404 = shalt.err (!%p401_p3)  }
  0x77   :  { %s405_s24 = scalar_lea.vmem %s94_s9, 16  ;;  %p410_p5 = scmp.lt.s32.totalorder %s94_s9, %s561_s16 }
  0x78   :  { %p406_p4 = scmp.ne.s32.totalorder %s94_s9, %s405_s24  ;;  %p411_p6 = scmp.lt.s32.totalorder %s587_s7, %s405_s24 }
  0x7a   :  { %p412_p7 = por %p411_p6, %p410_p5 }
  0x7c   :  { %p413_p8 = pnand %p412_p7, %p406_p4 }
  0x7e   :  { %416 = shalt.err (!%p413_p8)  }
  0x7f   :  { %96 = dma.hbm_to_vmem [thread:$0]  %s83_s0, 16, %s94_s9, [#allocation3 + $0x4] }
  0x80   :  { %s262_s25 = sshll.u32 %s632_s10, 4  ;;  %s538_s18 = smov [#allocation2 + $0x6]  }
  0x81   :  { %s127_s22 = sshll.u32 %s538_s18, 4  ;;  %s100_s28 = scalar_lea.hbm %s700_s1, %s262_s25  ;;  %s652_s22 = int_to_ptr.vmem [resolvable:$true] %s127_s22 }
  0x82   :  { %s417_s29 = scalar_lea.hbm %s100_s28, 16  ;;  %p420_p10 = scmp.lt.u32.totalorder %s100_s28, %s700_s1 }
  0x83   :  { %p418_p9 = scmp.ne.s32.totalorder %s100_s28, %s417_s29  ;;  %p421_p11 = scmp.lt.u32.totalorder %s578_s3, %s417_s29 }
  0x84   :  { %p423_p13 = scmp.lt.u32.totalorder %s417_s29, %s100_s28 }
  0x85   :  { %p422_p12 = por %p421_p11, %p420_p10 }
  0x87   :  { %p424_p0 = por %p423_p13, %p422_p12 }
  0x89   :  { %p425_p1 = pnand %p424_p0, %p418_p9 }
  0x8b   :  { %428 = shalt.err (!%p425_p1)  }
  0x8c   :  { %s429_s5 = scalar_lea.vmem %s637_s12, 16  ;;  %p434_p3 = scmp.lt.s32.totalorder %s637_s12, %s561_s16 }
  0x8d   :  { %p430_p2 = scmp.ne.s32.totalorder %s637_s12, %s429_s5  ;;  %p435_p4 = scmp.lt.s32.totalorder %s587_s7, %s429_s5 }
  0x8f   :  { %p436_p5 = por %p435_p4, %p434_p3 }
  0x91   :  { %p437_p6 = pnand %p436_p5, %p430_p2 }
  0x93   :  { %440 = shalt.err (!%p437_p6)  }
  0x94   :  { %113 = dma.hbm_to_vmem [thread:$0]  %s100_s28, 16, %s637_s12, [#allocation3 + $0x5] }
  0x95   :  { %s264_s6 = sshll.u32 %s634_s13, 4  ;;  %s265_s21 = sld [smem:[#allocation5 + $0x7]] }
  0x96   :  { %s117_s10 = scalar_lea.hbm %s700_s1, %s264_s6 }
  0x97   :  { %s441_s11 = scalar_lea.hbm %s117_s10, 16  ;;  %p444_p8 = scmp.lt.u32.totalorder %s117_s10, %s700_s1 }
  0x98   :  { %p442_p7 = scmp.ne.s32.totalorder %s117_s10, %s441_s11  ;;  %p445_p9 = scmp.lt.u32.totalorder %s578_s3, %s441_s11 }
  0x99   :  { %p447_p11 = scmp.lt.u32.totalorder %s441_s11, %s117_s10 }
  0x9a   :  { %p446_p10 = por %p445_p9, %p444_p8 }
  0x9c   :  { %p448_p12 = por %p447_p11, %p446_p10 }
  0x9e   :  { %p449_p13 = pnand %p448_p12, %p442_p7 }
  0xa0   :  { %452 = shalt.err (!%p449_p13)  }
  0xa1   :  { %s453_s12 = scalar_lea.vmem %s652_s22, 16  ;;  %p458_p1 = scmp.lt.s32.totalorder %s652_s22, %s561_s16 }
  0xa2   :  { %p454_p0 = scmp.ne.s32.totalorder %s652_s22, %s453_s12  ;;  %p459_p2 = scmp.lt.s32.totalorder %s587_s7, %s453_s12 }
  0xa4   :  { %p460_p3 = por %p459_p2, %p458_p1 }
  0xa6   :  { %p461_p4 = pnand %p460_p3, %p454_p0 }
  0xa8   :  { %464 = shalt.err (!%p461_p4)  }
  0xa9   :  { %130 = dma.hbm_to_vmem [thread:$0]  %s117_s10, 16, %s652_s22, [#allocation3 + $0x6] }
  0xaa   :  { %s539_s13 = smov [#allocation2 + $0x7]   ;;  %s266_s0 = sshll.u32 %s265_s21, 4 }
  0xab   :  { %s144_s17 = sshll.u32 %s539_s13, 4  ;;  %s134_s23 = scalar_lea.hbm %s700_s1, %s266_s0  ;;  %s145_s17 = int_to_ptr.vmem [resolvable:$true] %s144_s17 }
  0xac   :  { %s465_s24 = scalar_lea.hbm %s134_s23, 16  ;;  %p468_p6 = scmp.lt.u32.totalorder %s134_s23, %s700_s1 }
  0xad   :  { %p466_p5 = scmp.ne.s32.totalorder %s134_s23, %s465_s24  ;;  %p469_p7 = scmp.lt.u32.totalorder %s578_s3, %s465_s24 }
  0xae   :  { %p471_p9 = scmp.lt.u32.totalorder %s465_s24, %s134_s23 }
  0xaf   :  { %p470_p8 = por %p469_p7, %p468_p6 }
  0xb1   :  { %p472_p10 = por %p471_p9, %p470_p8 }
  0xb3   :  { %p473_p11 = pnand %p472_p10, %p466_p5 }
  0xb5   :  { %476 = shalt.err (!%p473_p11)  }
  0xb6   :  { %s477_s22 = scalar_lea.vmem %s145_s17, 16  ;;  %p482_p13 = scmp.lt.s32.totalorder %s145_s17, %s561_s16 }
  0xb7   :  { %p478_p12 = scmp.ne.s32.totalorder %s145_s17, %s477_s22  ;;  %p483_p0 = scmp.lt.s32.totalorder %s587_s7, %s477_s22 }
  0xb9   :  { %p484_p1 = por %p483_p0, %p482_p13 }
  0xbb   :  { %p485_p2 = pnand %p484_p1, %p478_p12 }
  0xbd   :  { %488 = shalt.err (!%p485_p2)  }
  0xbe   :  { %147 = dma.hbm_to_vmem [thread:$0]  %s134_s23, 16, %s145_s17, [#allocation3 + $0x7] }
  0xbf   :  { %513 = dma.done.wait [#allocation3], 16 }
  0xc0   :  { %514 = vsyncadd [#allocation3], 4294967280 }
  0xc1   :  { %515 = dma.done.wait [#allocation3 + $0x1], 16 }
  0xc2   :  { %516 = vsyncadd [#allocation3 + $0x1], 4294967280 }
  0xc3   :  { %517 = dma.done.wait [#allocation3 + $0x2], 16 }
  0xc4   :  { %518 = vsyncadd [#allocation3 + $0x2], 4294967280 }
  0xc5   :  { %519 = dma.done.wait [#allocation3 + $0x3], 16 }
  0xc6   :  { %520 = vsyncadd [#allocation3 + $0x3], 4294967280 }
  0xc7   :  { %521 = dma.done.wait [#allocation3 + $0x4], 16 }
  0xc8   :  { %522 = vsyncadd [#allocation3 + $0x4], 4294967280 }
  0xc9   :  { %523 = dma.done.wait [#allocation3 + $0x5], 16 }
  0xca   :  { %524 = vsyncadd [#allocation3 + $0x5], 4294967280 }
  0xcb   :  { %525 = dma.done.wait [#allocation3 + $0x6], 16 }
  0xcc   :  { %526 = vsyncadd [#allocation3 + $0x6], 4294967280 }
  0xcd   :  { %527 = dma.done.wait [#allocation3 + $0x7], 16 }
  0xce   :  { %528 = vsyncadd [#allocation3 + $0x7], 4294967280  ;;  %s540_s1 = smov [#allocation6]   ;;  %v165_v0 = vld [vmem:[#allocation2] sm:$0xff] }
  0xcf   :  { %s173_s16 = sshll.u32 %s540_s1, 4  ;;  %166 = vst [vmem:[#allocation6] sm:$0xff] %v165_v0  ;;  %s174_s16 = int_to_ptr.vmem [resolvable:$true] %s173_s16 }
  0xd0   :  { %s489_s3 = scalar_lea.vmem %s174_s16, 128  ;;  %p494_p4 = scmp.lt.s32.totalorder %s174_s16, %s174_s16 }
  0xd1   :  { %p490_p3 = scmp.ne.s32.totalorder %s174_s16, %s489_s3  ;;  %p495_p5 = scmp.lt.s32.totalorder %s489_s3, %s489_s3 }
  0xd3   :  { %p496_p6 = por %p495_p5, %p494_p4 }
  0xd5   :  { %p497_p7 = pnand %p496_p6, %p490_p3 }
  0xd7   :  { %500 = shalt.err (!%p497_p7)
}
  0xd8   :  { %s501_s27 = scalar_lea.hbm %s701_s2, 128 }
  0xd9   :  { %p502_p8 = scmp.ne.s32.totalorder %s701_s2, %s501_s27  ;;  %p505_p9 = scmp.lt.u32.totalorder %s501_s27, %s701_s2 }
  0xdb   :  { %p507_p10 = pnand %p505_p9, %p502_p8 }
  0xdd   :  { %510 = shalt.err (!%p507_p10)
}
  0xde   :  { %176 = dma.vmem_to_hbm [thread:$0]  %s174_s16, 128, %s701_s2, [#allocation7]  }
  0xdf   :  { %529 = dma.done.wait [#allocation7], 128  }
  0xe0   :  { %530 = vsyncadd [#allocation7], 4294967168 }
  0xe1   :  { %180 = vsyncpa [#allocation7], 1 }
  0xe2   :  { %181 = vsyncmov [#allocation3] }
  0xe5   :  { %s182_s21 = vpop.sfrf %181 }
  0xe6   :  { %p267_p11 = scmp.ne.s32.totalorder %s182_s21, 0 }
  0xe8   :  { %186 = shalt.err (%p267_p11)  }
  0xe9   :  { %188 = vsyncmov [#allocation3 + $0x1] }
  0xec   :  { %s189_s8 = vpop.sfrf %188 }
  0xed   :  { %p268_p12 = scmp.ne.s32.totalorder %s189_s8, 0 }
  0xef   :  { %193 = shalt.err (%p268_p12)  }
  0xf0   :  { %195 = vsyncmov [#allocation3 + $0x2] }
  0xf3   :  { %s196_s9 = vpop.sfrf %195 }
  0xf4   :  { %p269_p13 = scmp.ne.s32.totalorder %s196_s9, 0 }
  0xf6   :  { %200 = shalt.err (%p269_p13)  }
  0xf7   :  { %202 = vsyncmov [#allocation3 + $0x3] }
  0xfa   :  { %s203_s10 = vpop.sfrf %202 }
  0xfb   :  { %p270_p0 = scmp.ne.s32.totalorder %s203_s10, 0 }
  0xfd   :  { %207 = shalt.err (%p270_p0)  }
  0xfe   :  { %209 = vsyncmov [#allocation3 + $0x4] }
 0x101   :  { %s210_s2 = vpop.sfrf %209 }
 0x102   :  { %p271_p1 = scmp.ne.s32.totalorder %s210_s2, 0 }
 0x104   :  { %214 = shalt.err (%p271_p1)  }
 0x105   :  { %216 = vsyncmov [#allocation3 + $0x5] }
 0x108   :  { %s217_s11 = vpop.sfrf %216 }
 0x109   :  { %p272_p2 = scmp.ne.s32.totalorder %s217_s11, 0 }
 0x10b   :  { %221 = shalt.err (%p272_p2)  }
 0x10c   :  { %223 = vsyncmov [#allocation3 + $0x6] }
 0x10f   :  { %s224_s14 = vpop.sfrf %223 }
 0x110   :  { %p273_p3 = scmp.ne.s32.totalorder %s224_s14, 0 }
 0x112   :  { %228 = shalt.err (%p273_p3)  }
 0x113   :  { %230 = vsyncmov [#allocation3 + $0x7] }
 0x116   :  { %s231_s15 = vpop.sfrf %230 }
 0x117   :  { %p274_p4 = scmp.ne.s32.totalorder %s231_s15, 0 }
 0x119   :  { %235 = shalt.err (%p274_p4)  }

</bundles_post_ra>
